<compile_context>
chip_gen: v7x
topology: tpu7x:2x2x1
jax: 0.10.0
libtpu: 0.0.40
codegen_flags: <defaults>
</compile_context>

<pallas_src>
import math
import functools

import jax
import jax.numpy as jnp
from jax import lax
from jax.experimental import pallas as pl
from jax.experimental.pallas import tpu as pltpu


def _multihead_kernel(x_ref, wqkv_ref, wout_ref, o_ref, *, h, dh):
    # x_ref:    (1, S, d)     current batch element
    # wqkv_ref: (d, 3*h*dh)   fused projection, columns = [Q_all | K_all | V_all]
    # wout_ref: (h*dh, d)     output projection (rows head-major)
    # o_ref:    (1, S, d)
    S, d = x_ref.shape[1], x_ref.shape[2]
    hd = h * dh
    cd = x_ref.dtype                       # compute dtype for MXU operands (f32 or bf16)

    x = x_ref[0]                           # (S, d)
    wout = wout_ref[...]                   # (h*dh, d)

    # --- fused QKV projection: one wide matmul instead of h small ones ---
    qkv = jnp.dot(x, wqkv_ref[...], preferred_element_type=jnp.float32)   # (S, 3*h*dh) f32

    # Fold 1/sqrt(dh) into Q once (O(S*h*dh)) instead of scaling (S,S) scores per head.
    scale = 1.0 / math.sqrt(dh)
    q_all = (qkv[:, :hd] * scale).astype(cd)        # (S, h*dh)
    k_all = qkv[:, hd:2 * hd].astype(cd)            # (S, h*dh)
    v_all = qkv[:, 2 * hd:3 * hd].astype(cd)        # (S, h*dh)

    # Contract last dims directly: no explicit K transpose.
    qk_dims = (((1,), (1,)), ((), ()))

    out_acc = jnp.zeros((S, d), dtype=jnp.float32)
    for i in range(h):                               # static unroll; h is small
        lo, hi = i * dh, (i + 1) * dh
        q = q_all[:, lo:hi]                          # (S, dh)
        k = k_all[:, lo:hi]
        v = v_all[:, lo:hi]

        s = lax.dot_general(q, k, qk_dims,
                            preferred_element_type=jnp.float32)           # (S, S) f32
        s_max = jnp.max(s, axis=-1, keepdims=True)
        p_un = jnp.exp(s - s_max)                    # unnormalized probabilities
        row_sum = jnp.sum(p_un, axis=-1, keepdims=True)

        # Normalize AFTER the PV matmul: O(S*dh) work instead of O(S*S).
        acc = jnp.dot(p_un.astype(cd), v,
                      preferred_element_type=jnp.float32)                 # (S, dh) f32
        # (approx=True would use the EUP vrcp; kept exact to hold 1e-4 tolerance)
        head = acc * pl.reciprocal(row_sum, approx=False)

        # Concat-free output projection: accumulate head_i @ Wout[i*dh:(i+1)*dh].
        out_acc = out_acc + jnp.dot(head.astype(cd), wout[lo:hi, :],
                                    preferred_element_type=jnp.float32)

    o_ref[0] = out_acc.astype(o_ref.dtype)


def _fuse_qkv_weights(wqkv, h, dh):
    # wqkv: (h, d, 3*dh) -> (d, 3*h*dh) with layout [Q_all | K_all | V_all],
    # head-major within each third, so in-kernel per-head slicing is contiguous.
    d = wqkv.shape[1]
    wq = jnp.transpose(wqkv[:, :, :dh], (1, 0, 2)).reshape(d, h * dh)
    wk = jnp.transpose(wqkv[:, :, dh:2 * dh], (1, 0, 2)).reshape(d, h * dh)
    wv = jnp.transpose(wqkv[:, :, 2 * dh:3 * dh], (1, 0, 2)).reshape(d, h * dh)
    return jnp.concatenate([wq, wk, wv], axis=1)


def multihead_forward(x, wqkv, wout, *, h, dh):
    B, S, d = x.shape
    wqkv_fused = _fuse_qkv_weights(wqkv, h, dh).astype(x.dtype)
    wout = wout.astype(x.dtype)

    kernel = functools.partial(_multihead_kernel, h=h, dh=dh)
    return pl.pallas_call(
        kernel,
        out_shape=jax.ShapeDtypeStruct((B, S, d), x.dtype),
        grid_spec=pltpu.PrefetchScalarGridSpec(
            num_scalar_prefetch=0,
            grid=(B,),
            in_specs=[
                pl.BlockSpec((1, S, d), lambda b: (b, 0, 0)),
                # Constant index_map keeps the weights resident across grid steps.
                pl.BlockSpec((d, 3 * h * dh), lambda b: (0, 0)),
                pl.BlockSpec((h * dh, d), lambda b: (0, 0)),
            ],
            out_specs=pl.BlockSpec((1, S, d), lambda b: (b, 0, 0)),
        ),
        compiler_params=pltpu.CompilerParams(
            dimension_semantics=("parallel",)),
    )(x, wqkv_fused, wout)


def multihead_reference(x, wqkv, wout, *, h, dh):
    # Pure-JAX reference mirroring the PyTorch module exactly.
    outs = []
    for i in range(h):
        qkv = x @ wqkv[i]                       # (B, S, 3*dh)
        q, k, v = qkv[..., :dh], qkv[..., dh:2 * dh], qkv[..., 2 * dh:]
        s = jnp.einsum("bqd,bkd->bqk", q, k) / math.sqrt(dh)
        p = jax.nn.softmax(s, axis=-1)
        outs.append(jnp.einsum("bqk,bkd->bqd", p, v))
    all_heads = jnp.concatenate(outs, axis=-1)   # (B, S, h*dh)
    return all_heads @ wout


if __name__ == "__main__":
    # Small shapes consistent with the module: h heads, d model dim, dh = d/h.
    B, S, d, h = 2, 8, 32, 4
    dh = d // h

    key = jax.random.PRNGKey(0)
    kx, kw, ko = jax.random.split(key, 3)

    x = jax.random.normal(kx, (B, S, d), dtype=jnp.float32)
    # Deterministic parameter init (torch.randn analogue):
    wqkv = jax.random.normal(kw, (h, d, 3 * dh), dtype=jnp.float32)
    wout = jax.random.normal(ko, (h * dh, d), dtype=jnp.float32)

    # f32 path: must match the reference tightly.
    out = multihead_forward(x, wqkv, wout, h=h, dh=dh)
    out = jax.block_until_ready(out)
    ref = multihead_reference(x, wqkv, wout, h=h, dh=dh)
    assert out.shape == (B, S, d)
    assert jnp.allclose(out, ref, atol=1e-4, rtol=1e-4), "mismatch vs reference (f32)"

    # bf16 fast path (bf16 MXU operands, f32 accumulation): smoke test only.
    # torch.randn-scale weights make the softmax nearly one-hot, so bf16 rounding
    # can legitimately shift probabilities; we only check it runs and is finite.
    out_bf16 = multihead_forward(x.astype(jnp.bfloat16),
                                 wqkv.astype(jnp.bfloat16),
                                 wout.astype(jnp.bfloat16), h=h, dh=dh)
    out_bf16 = jax.block_until_ready(out_bf16)
    assert out_bf16.shape == (B, S, d)
    assert bool(jnp.all(jnp.isfinite(out_bf16.astype(jnp.float32))))

    print("KERNEL_OK")
</pallas_src>

<mosaic_0001>
module attributes {stable_mosaic.version = 11 : i64} {
  func.func @_multihead_kernel(%arg0: i32, %arg1: memref<1x8x32xf32, #tpu.memory_space<vmem>>, %arg2: memref<32x96xf32, #tpu.memory_space<vmem>>, %arg3: memref<32x32xf32, #tpu.memory_space<vmem>>, %arg4: memref<1x8x32xf32, #tpu.memory_space<vmem>>) attributes {dimension_semantics = [#tpu.dimension_semantics<parallel>], iteration_bounds = array<i64: 2>, scalar_prefetch = 0 : i64, scratch_operands = 0 : i64, tpu.core_type = #tpu.core_type<tc>, window_params = [{transform_indices = @transform_0, window_bounds = array<i64: 1, 8, 32>}, {pipeline_mode = #tpu.pipeline_mode<synchronous>, transform_indices = @transform_1, window_bounds = array<i64: 32, 96>}, {pipeline_mode = #tpu.pipeline_mode<synchronous>, transform_indices = @transform_2, window_bounds = array<i64: 32, 32>}, {transform_indices = @transform_3, window_bounds = array<i64: 1, 8, 32>}]} {
    %c0 = arith.constant 0 : index
    %c0_0 = arith.constant 0 : index
    %c0_1 = arith.constant 0 : index
    %0 = vector.load %arg1[%c0, %c0_0, %c0_1] : memref<1x8x32xf32, #tpu.memory_space<vmem>>, vector<1x8x32xf32>
    %1 = vector.shape_cast %0 : vector<1x8x32xf32> to vector<8x32xf32>
    %c0_2 = arith.constant 0 : index
    %c0_3 = arith.constant 0 : index
    %2 = vector.load %arg3[%c0_2, %c0_3] : memref<32x32xf32, #tpu.memory_space<vmem>>, vector<32x32xf32>
    %c0_4 = arith.constant 0 : index
    %c0_5 = arith.constant 0 : index
    %3 = vector.load %arg2[%c0_4, %c0_5] : memref<32x96xf32, #tpu.memory_space<vmem>>, vector<32x96xf32>
    %cst = arith.constant dense<0.000000e+00> : vector<8x96xf32>
    %4 = tpu.matmul %1, %3, %cst {dimension_numbers = #tpu.dot_dimension_numbers<[1], [0], [0], [1], [0, 0, 1, 1], [], []>} : vector<8x32xf32>, vector<32x96xf32>, vector<8x96xf32> -> vector<8x96xf32>
    %5 = vector.extract_strided_slice %4 {offsets = [0, 0], sizes = [8, 32], strides = [1, 1]} : vector<8x96xf32> to vector<8x32xf32>
    %cst_6 = arith.constant 0.353553385 : f32
    %6 = vector.broadcast %cst_6 : f32 to vector<8x32xf32>
    %7 = arith.mulf %5, %6 : vector<8x32xf32>
    %8 = vector.extract_strided_slice %4 {offsets = [0, 32], sizes = [8, 32], strides = [1, 1]} : vector<8x96xf32> to vector<8x32xf32>
    %9 = vector.extract_strided_slice %4 {offsets = [0, 64], sizes = [8, 32], strides = [1, 1]} : vector<8x96xf32> to vector<8x32xf32>
    %cst_7 = arith.constant 0.000000e+00 : f32
    %10 = vector.broadcast %cst_7 : f32 to vector<8x32xf32>
    %11 = vector.extract_strided_slice %7 {offsets = [0, 0], sizes = [8, 8], strides = [1, 1]} : vector<8x32xf32> to vector<8x8xf32>
    %12 = vector.extract_strided_slice %8 {offsets = [0, 0], sizes = [8, 8], strides = [1, 1]} : vector<8x32xf32> to vector<8x8xf32>
    %13 = vector.extract_strided_slice %9 {offsets = [0, 0], sizes = [8, 8], strides = [1, 1]} : vector<8x32xf32> to vector<8x8xf32>
    %cst_8 = arith.constant dense<0.000000e+00> : vector<8x8xf32>
    %14 = tpu.matmul %11, %12, %cst_8 {dimension_numbers = #tpu.dot_dimension_numbers<[1], [1], [0], [0], [0, 0, 1, 0], [], []>} : vector<8x8xf32>, vector<8x8xf32>, vector<8x8xf32> -> vector<8x8xf32>
    %cst_9 = arith.constant dense<0xFF800000> : vector<8xf32>
    %15 = vector.multi_reduction <maximumf>, %14, %cst_9 [1] : vector<8x8xf32> to vector<8xf32>
    %16 = vector.shape_cast %15 : vector<8xf32> to vector<8x1xf32>
    %17 = vector.broadcast %16 : vector<8x1xf32> to vector<8x8xf32>
    %18 = arith.subf %14, %17 : vector<8x8xf32>
    %19 = math.exp %18 : vector<8x8xf32>
    %cst_10 = arith.constant dense<0.000000e+00> : vector<8xf32>
    %20 = vector.multi_reduction <add>, %19, %cst_10 [1] : vector<8x8xf32> to vector<8xf32>
    %21 = vector.shape_cast %20 : vector<8xf32> to vector<8x1xf32>
    %cst_11 = arith.constant dense<0.000000e+00> : vector<8x8xf32>
    %22 = tpu.matmul %19, %13, %cst_11 {dimension_numbers = #tpu.dot_dimension_numbers<[1], [0], [0], [1], [0, 0, 1, 1], [], []>} : vector<8x8xf32>, vector<8x8xf32>, vector<8x8xf32> -> vector<8x8xf32>
    %23 = tpu.reciprocal %21 : vector<8x1xf32> -> vector<8x1xf32>
    %24 = vector.broadcast %23 : vector<8x1xf32> to vector<8x8xf32>
    %25 = arith.mulf %22, %24 : vector<8x8xf32>
    %26 = vector.extract_strided_slice %2 {offsets = [0, 0], sizes = [8, 32], strides = [1, 1]} : vector<32x32xf32> to vector<8x32xf32>
    %cst_12 = arith.constant dense<0.000000e+00> : vector<8x32xf32>
    %27 = tpu.matmul %25, %26, %cst_12 {dimension_numbers = #tpu.dot_dimension_numbers<[1], [0], [0], [1], [0, 0, 1, 1], [], []>} : vector<8x8xf32>, vector<8x32xf32>, vector<8x32xf32> -> vector<8x32xf32>
    %28 = arith.addf %10, %27 : vector<8x32xf32>
    %29 = vector.extract_strided_slice %7 {offsets = [0, 8], sizes = [8, 8], strides = [1, 1]} : vector<8x32xf32> to vector<8x8xf32>
    %30 = vector.extract_strided_slice %8 {offsets = [0, 8], sizes = [8, 8], strides = [1, 1]} : vector<8x32xf32> to vector<8x8xf32>
    %31 = vector.extract_strided_slice %9 {offsets = [0, 8], sizes = [8, 8], strides = [1, 1]} : vector<8x32xf32> to vector<8x8xf32>
    %cst_13 = arith.constant dense<0.000000e+00> : vector<8x8xf32>
    %32 = tpu.matmul %29, %30, %cst_13 {dimension_numbers = #tpu.dot_dimension_numbers<[1], [1], [0], [0], [0, 0, 1, 0], [], []>} : vector<8x8xf32>, vector<8x8xf32>, vector<8x8xf32> -> vector<8x8xf32>
    %cst_14 = arith.constant dense<0xFF800000> : vector<8xf32>
    %33 = vector.multi_reduction <maximumf>, %32, %cst_14 [1] : vector<8x8xf32> to vector<8xf32>
    %34 = vector.shape_cast %33 : vector<8xf32> to vector<8x1xf32>
    %35 = vector.broadcast %34 : vector<8x1xf32> to vector<8x8xf32>
    %36 = arith.subf %32, %35 : vector<8x8xf32>
    %37 = math.exp %36 : vector<8x8xf32>
    %cst_15 = arith.constant dense<0.000000e+00> : vector<8xf32>
    %38 = vector.multi_reduction <add>, %37, %cst_15 [1] : vector<8x8xf32> to vector<8xf32>
    %39 = vector.shape_cast %38 : vector<8xf32> to vector<8x1xf32>
    %cst_16 = arith.constant dense<0.000000e+00> : vector<8x8xf32>
    %40 = tpu.matmul %37, %31, %cst_16 {dimension_numbers = #tpu.dot_dimension_numbers<[1], [0], [0], [1], [0, 0, 1, 1], [], []>} : vector<8x8xf32>, vector<8x8xf32>, vector<8x8xf32> -> vector<8x8xf32>
    %41 = tpu.reciprocal %39 : vector<8x1xf32> -> vector<8x1xf32>
    %42 = vector.broadcast %41 : vector<8x1xf32> to vector<8x8xf32>
    %43 = arith.mulf %40, %42 : vector<8x8xf32>
    %44 = vector.extract_strided_slice %2 {offsets = [8, 0], sizes = [8, 32], strides = [1, 1]} : vector<32x32xf32> to vector<8x32xf32>
    %cst_17 = arith.constant dense<0.000000e+00> : vector<8x32xf32>
    %45 = tpu.matmul %43, %44, %cst_17 {dimension_numbers = #tpu.dot_dimension_numbers<[1], [0], [0], [1], [0, 0, 1, 1], [], []>} : vector<8x8xf32>, vector<8x32xf32>, vector<8x32xf32> -> vector<8x32xf32>
    %46 = arith.addf %28, %45 : vector<8x32xf32>
    %47 = vector.extract_strided_slice %7 {offsets = [0, 16], sizes = [8, 8], strides = [1, 1]} : vector<8x32xf32> to vector<8x8xf32>
    %48 = vector.extract_strided_slice %8 {offsets = [0, 16], sizes = [8, 8], strides = [1, 1]} : vector<8x32xf32> to vector<8x8xf32>
    %49 = vector.extract_strided_slice %9 {offsets = [0, 16], sizes = [8, 8], strides = [1, 1]} : vector<8x32xf32> to vector<8x8xf32>
    %cst_18 = arith.constant dense<0.000000e+00> : vector<8x8xf32>
    %50 = tpu.matmul %47, %48, %cst_18 {dimension_numbers = #tpu.dot_dimension_numbers<[1], [1], [0], [0], [0, 0, 1, 0], [], []>} : vector<8x8xf32>, vector<8x8xf32>, vector<8x8xf32> -> vector<8x8xf32>
    %cst_19 = arith.constant dense<0xFF800000> : vector<8xf32>
    %51 = vector.multi_reduction <maximumf>, %50, %cst_19 [1] : vector<8x8xf32> to vector<8xf32>
    %52 = vector.shape_cast %51 : vector<8xf32> to vector<8x1xf32>
    %53 = vector.broadcast %52 : vector<8x1xf32> to vector<8x8xf32>
    %54 = arith.subf %50, %53 : vector<8x8xf32>
    %55 = math.exp %54 : vector<8x8xf32>
    %cst_20 = arith.constant dense<0.000000e+00> : vector<8xf32>
    %56 = vector.multi_reduction <add>, %55, %cst_20 [1] : vector<8x8xf32> to vector<8xf32>
    %57 = vector.shape_cast %56 : vector<8xf32> to vector<8x1xf32>
    %cst_21 = arith.constant dense<0.000000e+00> : vector<8x8xf32>
    %58 = tpu.matmul %55, %49, %cst_21 {dimension_numbers = #tpu.dot_dimension_numbers<[1], [0], [0], [1], [0, 0, 1, 1], [], []>} : vector<8x8xf32>, vector<8x8xf32>, vector<8x8xf32> -> vector<8x8xf32>
    %59 = tpu.reciprocal %57 : vector<8x1xf32> -> vector<8x1xf32>
    %60 = vector.broadcast %59 : vector<8x1xf32> to vector<8x8xf32>
    %61 = arith.mulf %58, %60 : vector<8x8xf32>
    %62 = vector.extract_strided_slice %2 {offsets = [16, 0], sizes = [8, 32], strides = [1, 1]} : vector<32x32xf32> to vector<8x32xf32>
    %cst_22 = arith.constant dense<0.000000e+00> : vector<8x32xf32>
    %63 = tpu.matmul %61, %62, %cst_22 {dimension_numbers = #tpu.dot_dimension_numbers<[1], [0], [0], [1], [0, 0, 1, 1], [], []>} : vector<8x8xf32>, vector<8x32xf32>, vector<8x32xf32> -> vector<8x32xf32>
    %64 = arith.addf %46, %63 : vector<8x32xf32>
    %65 = vector.extract_strided_slice %7 {offsets = [0, 24], sizes = [8, 8], strides = [1, 1]} : vector<8x32xf32> to vector<8x8xf32>
    %66 = vector.extract_strided_slice %8 {offsets = [0, 24], sizes = [8, 8], strides = [1, 1]} : vector<8x32xf32> to vector<8x8xf32>
    %67 = vector.extract_strided_slice %9 {offsets = [0, 24], sizes = [8, 8], strides = [1, 1]} : vector<8x32xf32> to vector<8x8xf32>
    %cst_23 = arith.constant dense<0.000000e+00> : vector<8x8xf32>
    %68 = tpu.matmul %65, %66, %cst_23 {dimension_numbers = #tpu.dot_dimension_numbers<[1], [1], [0], [0], [0, 0, 1, 0], [], []>} : vector<8x8xf32>, vector<8x8xf32>, vector<8x8xf32> -> vector<8x8xf32>
    %cst_24 = arith.constant dense<0xFF800000> : vector<8xf32>
    %69 = vector.multi_reduction <maximumf>, %68, %cst_24 [1] : vector<8x8xf32> to vector<8xf32>
    %70 = vector.shape_cast %69 : vector<8xf32> to vector<8x1xf32>
    %71 = vector.broadcast %70 : vector<8x1xf32> to vector<8x8xf32>
    %72 = arith.subf %68, %71 : vector<8x8xf32>
    %73 = math.exp %72 : vector<8x8xf32>
    %cst_25 = arith.constant dense<0.000000e+00> : vector<8xf32>
    %74 = vector.multi_reduction <add>, %73, %cst_25 [1] : vector<8x8xf32> to vector<8xf32>
    %75 = vector.shape_cast %74 : vector<8xf32> to vector<8x1xf32>
    %cst_26 = arith.constant dense<0.000000e+00> : vector<8x8xf32>
    %76 = tpu.matmul %73, %67, %cst_26 {dimension_numbers = #tpu.dot_dimension_numbers<[1], [0], [0], [1], [0, 0, 1, 1], [], []>} : vector<8x8xf32>, vector<8x8xf32>, vector<8x8xf32> -> vector<8x8xf32>
    %77 = tpu.reciprocal %75 : vector<8x1xf32> -> vector<8x1xf32>
    %78 = vector.broadcast %77 : vector<8x1xf32> to vector<8x8xf32>
    %79 = arith.mulf %76, %78 : vector<8x8xf32>
    %80 = vector.extract_strided_slice %2 {offsets = [24, 0], sizes = [8, 32], strides = [1, 1]} : vector<32x32xf32> to vector<8x32xf32>
    %cst_27 = arith.constant dense<0.000000e+00> : vector<8x32xf32>
    %81 = tpu.matmul %79, %80, %cst_27 {dimension_numbers = #tpu.dot_dimension_numbers<[1], [0], [0], [1], [0, 0, 1, 1], [], []>} : vector<8x8xf32>, vector<8x32xf32>, vector<8x32xf32> -> vector<8x32xf32>
    %82 = arith.addf %64, %81 : vector<8x32xf32>
    %c0_28 = arith.constant 0 : index
    %c0_29 = arith.constant 0 : index
    %c0_30 = arith.constant 0 : index
    %83 = vector.load %arg4[%c0_28, %c0_29, %c0_30] : memref<1x8x32xf32, #tpu.memory_space<vmem>>, vector<1x8x32xf32>
    %84 = vector.shape_cast %83 : vector<1x8x32xf32> to vector<8x32xf32>
    %85 = vector.shape_cast %82 : vector<8x32xf32> to vector<1x8x32xf32>
    tpu.vector_store %arg4[%c0_28, %c0_29, %c0_30], %85 {strides = array<i32>} : memref<1x8x32xf32, #tpu.memory_space<vmem>>, vector<1x8x32xf32>,
    return
  }
  func.func @transform_0(%arg0: i32) -> (i32, i32, i32) {
    %c0_i32 = arith.constant 0 : i32
    %c0_i32_0 = arith.constant 0 : i32
    %c0_i32_1 = arith.constant 0 : i32
    return %arg0, %c0_i32, %c0_i32_0 : i32, i32, i32
  }
  func.func @transform_1(%arg0: i32) -> (i32, i32) {
    %c0_i32 = arith.constant 0 : i32
    %c0_i32_0 = arith.constant 0 : i32
    %c0_i32_1 = arith.constant 0 : i32
    return %c0_i32, %c0_i32_0 : i32, i32
  }
  func.func @transform_2(%arg0: i32) -> (i32, i32) {
    %c0_i32 = arith.constant 0 : i32
    %c0_i32_0 = arith.constant 0 : i32
    %c0_i32_1 = arith.constant 0 : i32
    return %c0_i32, %c0_i32_0 : i32, i32
  }
  func.func @transform_3(%arg0: i32) -> (i32, i32, i32) {
    %c0_i32 = arith.constant 0 : i32
    %c0_i32_0 = arith.constant 0 : i32
    %c0_i32_1 = arith.constant 0 : i32
    return %arg0, %c0_i32, %c0_i32_0 : i32, i32, i32
  }
}

</mosaic_0001>

<bundles_post_ra>
// kernel: tpu_custom_call.1
= control target key start
LH: loop header
LB: loop body
LE: loop exit
PB: predicated region body
PF: predicated region fallthrough
CT: control target
= control target key end

     0   :  { %8 = vsyncpa [#allocation3], 0  ;;  %s2111_s0 = inlined_call_operand.hbm [shape: f32[2,8,32], index: 0, kind: input, shape index: {}]   ;;  %s2112_s1 = inlined_call_operand.hbm [shape: f32[32,96], index: 1, kind: input, shape index: {}]   ;;  %s2113_s2 = inlined_call_operand.hbm [shape: f32[32,32], index: 2, kind: input, shape index: {}]   ;;  %s2114_s3 = inlined_call_operand.hbm [shape: f32[2,8,32], index: 3, kind: output, shape index: {}]  }
   0x1   :  { %10 = vsyncpa [#allocation3 + $0x1], 0 }
   0x2   :  { %11 = vsyncpa [#allocation6], 0 }
   0x3   :  { %12 = vsyncpa [#allocation4], 0 }
   0x4   :  { %14 = vsyncpa [#allocation4 + $0x1], 0  ;;  %s1800_s12 = smov 0   ;;  %s1802_s13 = smov 0  }
   0x5   :  { %s1804_s14 = smov 0   ;;  %s1806_s15 = smov 0  }
   0x6 LB: > { %s1821_s16 = sadd.s32 4294967295, %s1758_s15   ;;  %s1358_s17 = sadd.s32 4294967294, %s1758_s15   ;;  %s1758_s15 = sphi %s1806_s15, %s2134_s15   ;;  %s1754_s14 = sphi %s1804_s14, %s2133_s14   ;;  %s1750_s13 = sphi %s1802_s13, %s2132_s13   ;;  %s1746_s12 = sphi %s1800_s12, %s2131_s12  }
   0x7   : > { %p40_p0 = scmp.ne.s32.totalorder %s1750_s13, %s1746_s12  ;;  %p2115_p1 = scmp.eq.s32.totalorder %s1821_s16, 0 }
   0x8   : > { %p112_p3 = scmp.eq.s32.totalorder %s1358_s17, 1  ;;  %p1359_p5 = scmp.ge.s32.totalorder %s1758_s15, 1 }
   0x9   : > { %p1830_p4 = por %p2115_p1, %p40_p0  ;;  %p119_p7 = scmp.lt.s32.totalorder %s1758_s15, 3 }
   0xa   : > { %p1835_p6 = por %p112_p3, %p40_p0  ;;  %s1760_s21 = smov [#allocation5]  }
   0xb   : > { %s2118_s18 = scalar_select %p1830_p4, 1, 0 }
   0xc   : > { %s2119_s19 = scalar_select %p1835_p6, 1, 0 }
   0xd   : > { %p1840_p8 = pnand %p1359_p5, %p119_p7  ;;  %s131_s22 = sshll.u32 %s1760_s21, 4  ;;  %s1844_s22 = int_to_ptr.vmem [resolvable:$true] %s131_s22 }
   0xe   : > { %s1761_s24 = smov [#allocation7]   ;;  %s1602_s28 = scalar_lea.hbm %s2112_s1, 512 }
   0xf   : > { %p1515_p9 = pneg %p1840_p8  ;;  %s144_s25 = sshll.u32 %s1761_s24, 4  ;;  %s1855_s25 = int_to_ptr.vmem [resolvable:$true] %s144_s25 }
  0x10   : > { %p1603_p12 = scmp.ne.s32.totalorder %s2112_s1, %s1602_s28  ;;  %p1609_p5 = scmp.lt.u32.totalorder %s1602_s28, %s2112_s1 }
  0x11   : > { %p1851_p11 = pnand %p1515_p9, %p2115_p1 }
  0x13   : > { %p1604_p13 = pneg %p1851_p11 }
  0x15   : > { %p1605_p0 = pnand %p1604_p13, %p1603_p12 }
  0x17   : > { %p1606_p3 = pneg %p1605_p0 }
  0x19   : > { %p1611_p7 = pnand %p1609_p5, %p1606_p3 }
  0x1b   : > { %1614 = shalt.err (!%p1611_p7)
}
  0x1c   : > { %s1615_s6 = scalar_lea.vmem %s1844_s22, 512  ;;  %p1623_p2 = scmp.lt.s32.totalorder %s1844_s22, %s1844_s22 }
  0x1d   : > { %p1616_p9 = scmp.ne.s32.totalorder %s1844_s22, %s1615_s6  ;;  %p1624_p12 = scmp.lt.s32.totalorder %s1615_s6, %s1615_s6 }
  0x1f   : > { %p1618_p10 = pnand %p1616_p9, %p1604_p13  ;;  %p1625_p0 = por %p1624_p12, %p1623_p2 }
  0x21   : > { %p1619_p1 = pneg %p1618_p10 }
  0x23   : > { %p1626_p6 = pnand %p1625_p0, %p1619_p1 }
  0x25   : > { %1629 = shalt.err (!%p1626_p6)
}
  0x26   : > { %s1762_s7 = smov 128   ;;  %s1763_s8 = smov 8  }
  0x27   : > { %1518 = dma.hbm_to_vmem [thread:$0]  (!%p1851_p11), %s2112_s1, 512, %s1844_s22, [#allocation6], %s1762_s7, %s1762_s7, %s1763_s8  }
  0x28   : > { %s1630_s21 = scalar_lea.hbm %s2113_s2, 512 }
  0x29   : > { %p1631_p2 = scmp.ne.s32.totalorder %s2113_s2, %s1630_s21  ;;  %p1637_p10 = scmp.lt.u32.totalorder %s1630_s21, %s2113_s2 }
  0x2b   : > { %p1633_p1 = pnand %p1631_p2, %p1604_p13 }
  0x2d   : > { %p1634_p6 = pneg %p1633_p1 }
  0x2f   : > { %p1639_p3 = pnand %p1637_p10, %p1634_p6 }
  0x31   : > { %1642 = shalt.err (!%p1639_p3)
}
  0x32   : > { %s1643_s22 = scalar_lea.vmem %s1855_s25, 512  ;;  %p1651_p12 = scmp.lt.s32.totalorder %s1855_s25, %s1855_s25 }
  0x33   : > { %p1644_p5 = scmp.ne.s32.totalorder %s1855_s25, %s1643_s22  ;;  %p1652_p0 = scmp.lt.s32.totalorder %s1643_s22, %s1643_s22 }
  0x35   : > { %p1646_p7 = pnand %p1644_p5, %p1604_p13  ;;  %p1653_p2 = por %p1652_p0, %p1651_p12 }
  0x37   : > { %p1647_p9 = pneg %p1646_p7 }
  0x39   : > { %p1654_p1 = pnand %p1653_p2, %p1647_p9 }
  0x3b   : > { %1657 = shalt.err (!%p1654_p1)
}
  0x3c   : > { %1521 = dma.hbm_to_vmem [thread:$0]  (!%p1851_p11), %s2113_s2, 512, %s1855_s25, [#allocation6], %s1762_s7, %s1762_s7, %s1763_s8  }
  0x3d   : > { %s1910_s4 = sadd.s32 1, %s1758_s15   ;;  %s27_s23 = sadd.s32 1, %s1754_s14 }
  0x3e   : > { %s24_s5 = ssub.s32 %s1758_s15, %s1910_s4  ;;  %p34_p13 = scmp.ne.s32.totalorder %s1754_s14, %s1750_s13 }
  0x3f   : > { %p25_p6 = scmp.eq.s32.totalorder %s24_s5, 0  ;;  %p35_p10 = scmp.eq.s32.totalorder %s1758_s15, 0 }
  0x40   : > { %p2122_p3 = scmp.eq.s32.totalorder %s1821_s16, 1  ;;  %p1532_p7 = scmp.lt.s32.totalorder %s1758_s15, 2 }
  0x41   : > { %s1926_s9 = scalar_select %p25_p6, %s1754_s14, %s27_s23  }
  0x42   : > { %p1920_p5 = por %p2122_p3, %p34_p13  ;;  %p36_p9 = por %p35_p10, %p34_p13 }
  0x43   : > { %s158_s10 = sand.u32 1, %s1754_s14   ;;  %s1364_s25 = sshll.u32 %s1758_s15, 7 }
  0x44   : > { %s2123_s6 = scalar_select %p1920_p5, 1, 0 }
  0x45   : > { %s1363_s11 = sshll.u32 %s158_s10, 3  ;;  %s1933_s17 = scalar_lea.hbm %s2111_s0, %s1364_s25 }
  0x46   : > { %s162_s21 = scalar_lea.vmem [#allocation2], %s1363_s11  ;;  %p1937_p11 = pnand %p1532_p7, %p36_p9 }
  0x47   : > { %s169_s24 = sshll.u32 %s162_s21, 4  ;;  %s159_s27 = scalar_lea.sflag [#allocation3], %s158_s10  ;;  %s1935_s24 = int_to_ptr.vmem [resolvable:$true] %s169_s24 }
  0x48   : > { %s1658_s28 = scalar_lea.hbm %s1933_s17, 128  ;;  %p1660_p0 = pneg %p1937_p11 }
  0x49   : > { %p1659_p12 = scmp.ne.s32.totalorder %s1933_s17, %s1658_s28  ;;  %s1663_s30 = scalar_lea.hbm %s2111_s0, 256 }
  0x4a   : > { %p1664_p13 = scmp.lt.u32.totalorder %s1933_s17, %s2111_s0  ;;  %p1665_p6 = scmp.lt.u32.totalorder %s1663_s30, %s1658_s28 }
  0x4b   : > { %p1661_p2 = pnand %p1660_p0, %p1659_p12  ;;  %p1667_p3 = scmp.lt.u32.totalorder %s1658_s28, %s1933_s17 }
  0x4c   : > { %p1666_p10 = por %p1665_p6, %p1664_p13 }
  0x4d   : > { %p1662_p1 = pneg %p1661_p2 }
  0x4e   : > { %p1668_p7 = por %p1667_p3, %p1666_p10 }
  0x50   : > { %p1669_p9 = pnand %p1668_p7, %p1662_p1 }
  0x52   : > { %1672 = shalt.err (!%p1669_p9)
}
  0x53   : > { %s1673_s10 = scalar_lea.vmem %s1935_s24, 128  ;;  %s1764_s11 = smov [#allocation2]  }
  0x54   : > { %p1674_p12 = scmp.ne.s32.totalorder %s1935_s24, %s1673_s10  ;;  %s1678_s25 = sshll.u32 %s1764_s11, 4  ;;  %s1679_s25 = int_to_ptr.vmem [resolvable:$false] %s1678_s25 }
  0x55   : > { %s1680_s7 = scalar_lea.vmem %s1679_s25, 256  ;;  %p1681_p4 = scmp.lt.s32.totalorder %s1935_s24, %s1679_s25 }
  0x56   : > { %p1676_p2 = pnand %p1674_p12, %p1660_p0  ;;  %p1682_p13 = scmp.lt.s32.totalorder %s1680_s7, %s1673_s10 }
  0x58   : > { %p1677_p5 = pneg %p1676_p2  ;;  %p1683_p6 = por %p1682_p13, %p1681_p4 }
  0x5a   : > { %p1684_p10 = pnand %p1683_p6, %p1677_p5 }
  0x5c   : > { %1687 = shalt.err (!%p1684_p10)
}
  0x5d   : > { %1525 = dma.hbm_to_vmem [thread:$0]  (!%p1937_p11), %s1933_s17, 128, %s1935_s24, %s159_s27  }
  0x5e   : > { %178 = sbr.rel (%p1840_p8) target bundleno = 2377 (0x949), region = 32  ;;  %s1969_s8 = sand.u32 (!%p1840_p8), 1, %s1750_s13  }
  0x5f   : > { %s1366_s21 = sshll.u32 (!%p1840_p8), %s1969_s8, 3  ;;  %s181_s28 = scalar_lea.sflag (!%p1840_p8), [#allocation3], %s1969_s8 }
  0x60   : > { %s184_s22 = scalar_lea.vmem (!%p1840_p8), [#allocation2], %s1366_s21  ;;  %p2125_p4 = scmp.ne.s32.totalorder (!%p1840_p8), %s2118_s18, 0 }
  0x65   : > { %1733 = dma.done.wait (%p2125_p4), %s181_s28, 128  }
  0x66   : > { %1735 = vsyncadd (%p2125_p4), %s181_s28, 4294967168  ;;  %p2126_p5 = scmp.eq.s32.totalorder %s1821_s16, 0 }
  0x68   : > { %1737 = dma.done.wait (%p2126_p5), [#allocation6], 1024   ;;  %p2127_p8 = pmov %p2126_p5 }
  0x69   : > { %v1765_v0 = vmov 0.0|0.0   ;;  %vm1766_vm0 = vmmov 0   ;;  %v1767_v1 = vmov 0.0   ;;  %v220_v2 = vld [vmem:[#allocation5] sm:$0xff]  ;;  %v221_v3 = vld [vmem:[#allocation5 + $0x8] sm:$0xff]  ;;  %v222_v4 = vld [vmem:[#allocation5 + $0x10] sm:$0xff] }
  0x6a   : > { %1739 = vsyncadd (%p2127_p8), [#allocation6], 4294966272  ;;  %1491 = vmatprep.subr.bf16.mxu0 %v1765_v0  ;;  %1428 = vmatprep.mubr.msk.f32.mxu0 %vm1766_vm0, %v1767_v1  ;;  %v1492_v5 = vpack.c.bf16 %v221_v3, %v220_v2  ;;  %v223_v6 = vld [vmem:[#allocation5 + $0x18] sm:$0xff]  ;;  %vm224_vm1 = vcmask 261120   ;;  %s1768_s18 = smov 64   ;;  %s1769_s20 = smov 96  }
  0x6b   : > { %1431 = vmatprep.subr.mxu1 %v1767_v1  ;;  %1433 = vmatprep.mubr.msk.f32.mxu1 %vm1766_vm0, %v1767_v1  ;;  %v1495_v7 = vpack.c.bf16 %v223_v6, %v222_v4  ;;  %v215_v8 = vld [vmem:[%s184_s22] sm:$0xff]  ;;  %s1770_s17 = smov 88   ;;  %s1771_s24 = smov 120   ;;  %vm302_vm2 = vcmask 64512   ;;  %v217_v37 = vld [vmem:[#allocation7 + $0x8] sm:$0xff]  ;;  %v216_v49 = vld [vmem:[#allocation7] sm:$0xff] }
  0x6c   : > { %1493 = vmatpush3.bf16.msra.mxu0 %v1492_v5  ;;  %s1772_s26 = smov 56   ;;  %s1773_s27 = smov 112   ;;  %v218_v58 = vld [vmem:[#allocation7 + $0x10] sm:$0xff] }
  0x6d   : > { %1494 = vmatprep.subr.bf16.mxu0 %v1765_v0  ;;  %s1774_s29 = smov 80   ;;  %s1775_s30 = smov 48  }
  0x6e   : > { %s1776_s23 = smov 72   ;;  %s1777_s5 = smov 104  }
  0x6f   : > { %s1778_s10 = smov 40   ;;  %s1388_s11 = sshll.u32 %s1821_s16, 7 }
  0x70   : > { %1496 = vmatpush3.bf16.msra.mxu0 %v1495_v7  ;;  %s214_s25 = scalar_lea.vmem [#allocation8], %s1366_s21  ;;  %p2128_p0 = scmp.ne.s32.totalorder %s2123_s6, 0 }
  0x71   : > { %1451 = vmatprep.subr.mxu0 %v1767_v1  ;;  %s1269_s7 = sshll.u32 %s214_s25, 4  ;;  %s1779_s16 = smov [#allocation8]   ;;  %s2068_s7 = int_to_ptr.vmem [resolvable:$true] %s1269_s7 }
  0x72   : > { %s1692_s21 = sshll.u32 %s1779_s16, 4  ;;  %s1693_s21 = int_to_ptr.vmem [resolvable:$false] %s1692_s21 }
  0x73   : > { %1429 = vmatmul.mubr.msk.f32.vlgmr.msra.gmra.mrb[0].mxu0 %vm224_vm1, %v215_v8  ;;  %p1695_p7 = scmp.lt.s32.totalorder %s2068_s7, %s1693_s21 }
  0x74   : > { %1453 = vmatprep.mubr.msk.f32.mxu0 %vm1766_vm0, %v1767_v1  ;;  %1452 = vmatpush3.msra.mxu0 %v217_v37 }
  0x75   : > { %1456 = vmatprep.subr.mxu0 %v1767_v1 }
 0x146   : > { %v1992_v9 = vpop.f32.mrb[0].mxu0 }
 0x147   : > { %387 = vrot.lane.b32.xlu1 %v1992_v9, %s1768_s18  ;;  %300 = vrot.lane.b32.xlu0 %v1992_v9, %s1769_s20  ;;  %v1430_v10 = vpop.f32.mrb[1].mxu0  ;;  %v298_v11 = vmul.f32 0.35355338, %v1992_v9  ;;  %s2066_s18 = scalar_lea.hbm %s2114_s3, %s1388_s11  ;;  %s1256_s20 = scalar_lea.sflag [#allocation4], %s1969_s8 }
 0x14b   : > { %467 = vrot.lane.b32.xlu1 %v1992_v9, %s1770_s17  ;;  %s1688_s17 = scalar_lea.vmem %s2068_s7, 128 }
 0x14c   : > { %p1689_p11 = scmp.ne.s32.totalorder %s2068_s7, %s1688_s17 }
 0x14e   : > { %p1690_p1 = pnand %p1689_p11, %p2128_p0 }
 0x14f   : > { %465 = vrot.lane.b32.xlu1 %v298_v11, %s1771_s24  ;;  %s1694_s24 = scalar_lea.vmem %s1693_s21, 256 }
 0x150   : > { %p1691_p3 = pneg %p1690_p1  ;;  %p1696_p9 = scmp.lt.s32.totalorder %s1694_s24, %s1688_s17 }
 0x152   : > { %p1697_p12 = por %p1696_p9, %p1695_p7 }
 0x154   : > { %p1698_p2 = pnand %p1697_p12, %p1691_p3 }
 0x1b9   : > { %v301_v12 = vpop.permute.xlu0 %300  ;;  %v388_v13 = vpop.permute.xlu1 %387 }
 0x1ba   : > { %1432 = vmatpush3.xpose.msk.msra.mxu1 %vm302_vm2, %v301_v12 }
 0x1bb   : > { %1436 = vmatprep.subr.mxu1 %v1767_v1 }
 0x1bd   : > { %1434 = vmatmul.mubr.msk.f32.vlgmr.msra.gmra.mrb[0].mxu1 %vm302_vm2, %v298_v11  ;;  %v468_v20 = vpop.permute.xlu1 %467 }
 0x1be   : > { %1437 = vmatpush3.msra.mxu1 %v388_v13  ;;  %1438 = vmatprep.mubr.msk.f32.mxu1 %vm1766_vm0, %v1767_v1 }
 0x1bf   : > { %1441 = vmatprep.subr.mxu1 %v1767_v1 }
 0x1c1   : > { %v466_v22 = vpop.permute.xlu1 %465 }
 0x290   : > { %v374_v14 = vpop.f32.mrb[0].mxu1 }
 0x291   : > { %v1435_v15 = vpop.f32.mrb[1].mxu1  ;;  %v378_v16 = vsel %vm302_vm2, %v374_v14, -inf }
 0x292   : > { %379 = vmax.xlane.f32.xlu0 %v378_v16 }
 0x2a8   : > { %552 = vrot.lane.b32.xlu0 %v1992_v9, %s1772_s26 }
 0x2ac   : > { %776 = vrot.lane.b32.xlu0 %v298_v11, %s1773_s27 }
 0x31f   : > { %v380_v17 = vpop.xlane.xlu0 %379 }
 0x320   : > { %v381_v18 = vsub.f32 %v374_v14, %v380_v17 }
 0x322   : > { %v382_v19 = vmul.f32 1.442695, %v381_v18 }
 0x323   : > { %v553_v23 = vpop.permute.xlu0 %552 }
 0x324   : > { %1586 = vpow2.f32 %v382_v19 }
 0x327   : > { %v777_v35 = vpop.permute.xlu0 %776 }
 0x32e   : > { %v1587_v21 = vpop.eup %1586 }
 0x32f   : > { %1439 = vmatmul.mubr.msk.f32.vlgmr.msra.gmra.mrb[2].mxu1 %vm302_vm2, %v1587_v21  ;;  %v384_v48 = vsel %vm302_vm2, %v1587_v21, 0.0 }
 0x330   : > { %1442 = vmatpush3.xpose.msk.msra.mxu1 %vm302_vm2, %v468_v20  ;;  %1443 = vmatprep.mubr.msk.f32.mxu1 %vm1766_vm0, %v1767_v1 }
 0x331   : > { %1446 = vmatprep.subr.mxu1 %v1767_v1 }
 0x333   : > { %1444 = vmatmul.mubr.msk.f32.vlgmr.msra.gmra.mrb[4].mxu1 %vm302_vm2, %v466_v22 }
 0x334   : > { %1447 = vmatpush3.msra.mxu1 %v553_v23  ;;  %1448 = vmatprep.mubr.msk.f32.mxu1 %vm1766_vm0, %v1767_v1 }
 0x335   : > { %1461 = vmatprep.subr.mxu1 %v1767_v1 }
 0x402   : > { %v2015_v24 = vpop.f32.mrb[2].mxu1 }
 0x403   : > { %v1440_v25 = vpop.f32.mrb[3].mxu1 }
 0x406   : > { %v539_v26 = vpop.f32.mrb[4].mxu1 }
 0x407   : > { %v1445_v27 = vpop.f32.mrb[5].mxu1  ;;  %v543_v28 = vsel %vm302_vm2, %v539_v26, -inf }
 0x408   : > { %544 = vmax.xlane.f32.xlu1 %v543_v28 }
 0x419   : > { %778 = vrot.lane.b32.xlu1 %v1992_v9, %s1774_s29 }
 0x41d   : > { %863 = vrot.lane.b32.xlu1 %v1992_v9, %s1775_s30 }
 0x421   : > { %1017 = vrot.lane.b32.xlu1 %v1992_v9, %s1776_s23 }
 0x425   : > { %1015 = vrot.lane.b32.xlu1 %v298_v11, %s1777_s5 }
 0x495   : > { %v545_v29 = vpop.xlane.xlu1 %544 }
 0x496   : > { %v546_v30 = vsub.f32 %v539_v26, %v545_v29 }
 0x498   : > { %v547_v31 = vmul.f32 1.442695, %v546_v30 }
 0x499   : > { %v779_v32 = vpop.permute.xlu1 %778 }
 0x49a   : > { %1588 = vpow2.f32 %v547_v31 }
 0x49d   : > { %v864_v36 = vpop.permute.xlu1 %863 }
 0x4a1   : > { %v1018_v38 = vpop.permute.xlu1 %1017 }
 0x4a4   : > { %v1589_v33 = vpop.eup %1588 }
 0x4a5   : > { %1449 = vmatmul.mubr.msk.f32.vlgmr.msra.gmra.mrb[6].mxu1 %vm302_vm2, %v1589_v33  ;;  %v549_v34 = vsel %vm302_vm2, %v1589_v33, 0.0  ;;  %v1016_v39 = vpop.permute.xlu1 %1015 }
 0x4a6   : > { %1462 = vmatpush3.xpose.msk.msra.mxu1 %vm302_vm2, %v779_v32  ;;  %550 = vadd.xlane.f32.xlu1 %v549_v34 }
 0x4a7   : > { %1463 = vmatprep.mubr.msk.f32.mxu1 %vm1766_vm0, %v1767_v1  ;;  %1466 = vmatprep.subr.mxu1 %v1767_v1 }
 0x4a9   : > { %1464 = vmatmul.mubr.msk.f32.vlgmr.msra.gmra.mrb[8].mxu1 %vm302_vm2, %v777_v35 }
 0x4aa   : > { %1467 = vmatpush3.msra.mxu1 %v864_v36  ;;  %1468 = vmatprep.mubr.msk.f32.mxu1 %vm1766_vm0, %v1767_v1 }
 0x4ab   : > { %1476 = vmatprep.subr.mxu1 %v1767_v1 }
 0x533   : > { %v551_v40 = vpop.xlane.xlu1 %550 }
 0x534   : > { %1590 = vrcp.f32 %v551_v40 }
 0x53e   : > { %v1591_v41 = vpop.eup %1590 }
 0x578   : > { %v624_v42 = vpop.f32.mrb[6].mxu1 }
 0x579   : > { %v629_v43 = vmul.f32 %v1591_v41, %v624_v42  ;;  %v1450_v44 = vpop.f32.mrb[7].mxu1 }
 0x57b   : > { %1454 = vmatmul.mubr.msk.f32.vlgmr.msra.gmra.mrb[2].mxu0 %vm302_vm2, %v629_v43 }
 0x57c   : > { %v850_v45 = vpop.f32.mrb[8].mxu1  ;;  %1458 = vmatprep.mubr.msk.f32.mxu0 %vm1766_vm0, %v1767_v1  ;;  %1457 = vmatpush3.msra.mxu0 %v216_v49 }
 0x57d   : > { %v1465_v46 = vpop.f32.mrb[9].mxu1  ;;  %v854_v47 = vsel %vm302_vm2, %v850_v45, -inf  ;;  %1471 = vmatprep.subr.mxu0 %v1767_v1 }
 0x57e   : > { %855 = vmax.xlane.f32.xlu0 %v854_v47 }
 0x582   : > { %385 = vadd.xlane.f32.xlu0 %v384_v48 }
 0x60b   : > { %v856_v50 = vpop.xlane.xlu0 %855 }
 0x60c   : > { %v857_v51 = vsub.f32 %v850_v45, %v856_v50 }
 0x60e   : > { %v858_v52 = vmul.f32 1.442695, %v857_v51 }
 0x60f   : > { %v386_v53 = vpop.xlane.xlu0 %385 }
 0x610   : > { %1592 = vpow2.f32 %v858_v52 }
 0x611   : > { %1594 = vrcp.f32 %v386_v53 }
 0x61a   : > { %v1593_v54 = vpop.eup %1592 }
 0x61b   : > { %v1595_v55 = vpop.eup %1594  ;;  %1469 = vmatmul.mubr.msk.f32.vlgmr.msra.gmra.mrb[10].mxu1 %vm302_vm2, %v1593_v54  ;;  %v860_v56 = vsel %vm302_vm2, %v1593_v54, 0.0 }
 0x61c   : > { %v464_v57 = vmul.f32 %v1595_v55, %v2015_v24  ;;  %1477 = vmatpush3.xpose.msk.msra.mxu1 %vm302_vm2, %v1018_v38  ;;  %861 = vadd.xlane.f32.xlu0 %v860_v56 }
 0x61d   : > { %1478 = vmatprep.mubr.msk.f32.mxu1 %vm1766_vm0, %v1767_v1 }
 0x61e   : > { %1459 = vmatmul.mubr.msk.f32.vlgmr.msra.gmra.mrb[2].mxu0 %vm302_vm2, %v464_v57 }
 0x61f   : > { %1479 = vmatmul.mubr.msk.f32.vlgmr.msra.gmra.mrb[12].mxu1 %vm302_vm2, %v1016_v39  ;;  %1473 = vmatprep.mubr.msk.f32.mxu0 %vm1766_vm0, %v1767_v1 }
 0x620   : > { %1472 = vmatpush3.msra.mxu0 %v218_v58 }
 0x621   : > { %1481 = vmatprep.subr.mxu0 %v1767_v1 }
 0x6a9   : > { %v862_v59 = vpop.xlane.xlu0 %861 }
 0x6aa   : > { %1596 = vrcp.f32 %v862_v59 }
 0x6b4   : > { %v1597_v60 = vpop.eup %1596 }
 0x6ee   : > { %v935_v61 = vpop.f32.mrb[10].mxu1 }
 0x6ef   : > { %v940_v62 = vmul.f32 %v1597_v60, %v935_v61  ;;  %v1470_v63 = vpop.f32.mrb[11].mxu1 }
 0x6f1   : > { %1474 = vmatmul.mubr.msk.f32.vlgmr.msra.gmra.mrb[2].mxu0 %vm302_vm2, %v940_v62 }
 0x6f2   : > { %v1089_v0 = vpop.f32.mrb[12].mxu1  ;;  %1483 = vmatprep.mubr.msk.f32.mxu0 %vm1766_vm0, %v1767_v1 }
 0x6f3   : > { %v1480_v2 = vpop.f32.mrb[13].mxu1  ;;  %v1093_v3 = vsel %vm302_vm2, %v1089_v0, -inf }
 0x6f4   : > { %1094 = vmax.xlane.f32.xlu0 %v1093_v3 }
 0x70a   : > { %1102 = vrot.lane.b32.xlu0 %v1992_v9, %s1778_s10  ;;  %v219_v9 = vld [vmem:[#allocation7 + $0x18] sm:$0xff] }
 0x781   : > { %v1095_v4 = vpop.xlane.xlu0 %1094 }
 0x782   : > { %v1096_v5 = vsub.f32 %v1089_v0, %v1095_v4 }
 0x784   : > { %v1097_v6 = vmul.f32 1.442695, %v1096_v5 }
 0x785   : > { %v1103_v7 = vpop.permute.xlu0 %1102 }
 0x786   : > { %1598 = vpow2.f32 %v1097_v6  ;;  %1482 = vmatpush3.msra.mxu0 %v1103_v7 }
 0x787   : > { %1486 = vmatprep.subr.mxu0 %v1767_v1 }
 0x790   : > { %v1599_v8 = vpop.eup %1598 }
 0x791   : > { %1484 = vmatmul.mubr.msk.f32.vlgmr.msra.gmra.mrb[4].mxu0 %vm302_vm2, %v1599_v8  ;;  %v1099_v10 = vsel %vm302_vm2, %v1599_v8, 0.0 }
 0x792   : > { %1100 = vadd.xlane.f32.xlu1 %v1099_v10  ;;  %1488 = vmatprep.mubr.msk.f32.mxu0 %vm1766_vm0, %v1767_v1 }
 0x793   : > { %1487 = vmatpush3.msra.mxu0 %v219_v9 }
 0x81f   : > { %v1101_v11 = vpop.xlane.xlu1 %1100 }
 0x820   : > { %1600 = vrcp.f32 %v1101_v11 }
 0x82a   : > { %v1601_v12 = vpop.eup %1600 }
 0x864   : > { %v1174_v13 = vpop.f32.mrb[4].mxu0 }
 0x865   : > { %v1179_v14 = vmul.f32 %v1601_v12, %v1174_v13  ;;  %v1485_v15 = vpop.f32.mrb[5].mxu0 }
 0x867   : > { %1489 = vmatmul.mubr.msk.f32.vlgmr.msra.gmra.mrb[2].mxu0 %vm302_vm2, %v1179_v14 }
 0x93a   : > { %v1249_v1 = vpop.f32.mrb[2].mxu0 }
 0x93b   : > { %1254 = vst.msk [vmem:[%s214_s25] sm:$0xff] %vm224_vm1, %v1249_v1  ;;  %v1490_v16 = vpop.f32.mrb[3].mxu0 }
 0x93c   : > { %1701 = shalt.err (!%p1698_p2)
}
 0x93d   : > { %s1702_s8 = scalar_lea.hbm %s2066_s18, 128  ;;  %s1706_s29 = scalar_lea.hbm %s2114_s3, 256 }
 0x93e   : > { %p1703_p13 = scmp.ne.s32.totalorder %s2066_s18, %s1702_s8  ;;  %p1707_p4 = scmp.lt.u32.totalorder %s2066_s18, %s2114_s3 }
 0x93f   : > { %p1708_p5 = scmp.lt.u32.totalorder %s1706_s29, %s1702_s8  ;;  %p1710_p11 = scmp.lt.u32.totalorder %s1702_s8, %s2066_s18 }
 0x940   : > { %p1704_p6 = pnand %p1703_p13, %p2128_p0 }
 0x941   : > { %p1709_p8 = por %p1708_p5, %p1707_p4 }
 0x942   : > { %p1705_p10 = pneg %p1704_p6 }
 0x943   : > { %p1711_p1 = por %p1710_p11, %p1709_p8 }
 0x945   : > { %p1712_p3 = pnand %p1711_p1, %p1705_p10 }
 0x947   : > { %1715 = shalt.err (!%p1712_p3)
}
 0x948   : > { %1513 = dma.vmem_to_hbm [thread:$0]  (%p2128_p0), %s2068_s7, 128, %s2066_s18, %s1256_s20  }
 0x949 PF: > { %s1281_s5 = sand.u32 1, %s1746_s12   ;;  %p2129_p7 = scmp.ne.s32.totalorder %s2119_s19, 0 }
 0x94a   : > { %p2130_p9 = scmp.ge.s32.totalorder %s1758_s15, 2  ;;  %s1282_s10 = scalar_lea.sflag [#allocation4], %s1281_s5 }
 0x94c   : > { %p1527_p12 = pnand %p2130_p9, %p2129_p7 }
 0x94e   : > { %1741 = dma.done.wait (!%p1527_p12), %s1282_s10, 128  }
 0x94f   : > { %1743 = vsyncadd (!%p1527_p12), %s1282_s10, 4294967168  ;;  %p17_p2 = scmp.ge.s32.totalorder %s1910_s4, 4   ;;  %s2131_s12 = smov %s1750_s13 }
 0x950   : > { %s2132_s13 = smov %s1754_s14  ;;  %s2133_s14 = smov %s1926_s9 }
 0x951   : > { %s2134_s15 = smov %s1910_s4  ;;  %19 = sbr.rel (!%p17_p2) target bundleno = 6 (0x6), region = 85 }
 0x958   :  { %1287 = vsyncpa [#allocation3], 1 }
 0x959   :  { %1289 = vsyncpa [#allocation3 + $0x1], 1 }
 0x95a   :  { %1290 = vsyncpa [#allocation6], 1 }
 0x95b   :  { %1291 = vsyncpa [#allocation4], 1 }
 0x95c   :  { %1293 = vsyncpa [#allocation4 + $0x1], 1 }

</bundles_post_ra>
